<compile_context>
chip_gen: v7x
topology: tpu7x:2x2x1
jax: 0.10.0
libtpu: 0.0.40
codegen_flags: <defaults>
</compile_context>

<pallas_src>
import functools

import jax
import jax.numpy as jnp
from jax.experimental import pallas as pl
from jax.experimental.pallas import tpu as pltpu

_VMEM_LIMIT_BYTES = 48 * 1024 * 1024  # explicit scoped-VMEM budget (v7x-safe)
_NEG_INF = -1e30                      # finite mask fill (NaN-safe vs -inf)


# ----------------------------------------------------------------------------
# Stage 1: lane-dense QKV projection (computed exactly once per token tile)
# ----------------------------------------------------------------------------
def _qkv_kernel(x_ref, w_ref, q_ref, k_ref, v_ref, *, n_embd):
    # x_ref: (1, blk, C) bf16   w_ref: (C, 3C) bf16   q/k/v_ref: (1, blk, C) bf16
    x = x_ref[0]                                                  # (blk, C)
    qkv = jnp.dot(x, w_ref[...], preferred_element_type=jnp.float32)  # (blk, 3C) f32
    qkv = qkv.astype(q_ref.dtype)
    C = n_embd
    q_ref[0] = qkv[:, :C]
    k_ref[0] = qkv[:, C:2 * C]
    v_ref[0] = qkv[:, 2 * C:3 * C]


# ----------------------------------------------------------------------------
# Stage 2: causal flash attention + fused output projection
# ----------------------------------------------------------------------------
def _flash_mha_kernel(q_ref, k_ref, v_ref, wp_ref, b_ref, o_ref,
                      m_ref, l_ref, acc_ref, *, num_heads, head_size, block):
    # q_ref/k_ref/v_ref: (1, blk, C) bf16   wp_ref: (C, C) bf16   b_ref: (1, C) f32
    # o_ref: (1, blk, C)   scratch: m/l (blk, H) f32, acc (blk, C) f32
    qi = pl.program_id(1)
    kt = pl.program_id(2)

    @pl.when(kt == 0)
    def _init():
        m_ref[...] = jnp.full_like(m_ref, _NEG_INF)
        l_ref[...] = jnp.zeros_like(l_ref)
        acc_ref[...] = jnp.zeros_like(acc_ref)

    # Skip k tiles strictly above the causal diagonal (their DMA is also
    # avoided via the clamped index_map in the wrapper).
    @pl.when(kt <= qi)
    def _update():
        rows = qi * block + jax.lax.broadcasted_iota(jnp.int32, (block, block), 0)
        cols = kt * block + jax.lax.broadcasted_iota(jnp.int32, (block, block), 1)
        causal = rows >= cols

        q = q_ref[0]                                              # (blk, C) bf16
        k = k_ref[0]
        v = v_ref[0]
        for h in range(num_heads):                                # unrolled
            lo = h * head_size
            hi = lo + head_size
            # scores (blk, blk), bf16 operands, f32 accumulate
            s = jax.lax.dot_general(q[:, lo:hi], k[:, lo:hi],
                                    (((1,), (1,)), ((), ())),
                                    preferred_element_type=jnp.float32)
            s = jnp.where(causal, s, _NEG_INF)

            m_prev = m_ref[:, h:h + 1]                            # (blk, 1) f32
            l_prev = l_ref[:, h:h + 1]
            m_new = jnp.maximum(m_prev, jnp.max(s, axis=-1, keepdims=True))
            alpha = jnp.exp(m_prev - m_new)
            p = jnp.exp(s - m_new)                                # f32 softmax stats
            l_ref[:, h:h + 1] = alpha * l_prev + jnp.sum(p, axis=-1, keepdims=True)
            m_ref[:, h:h + 1] = m_new
            acc_ref[:, lo:hi] = alpha * acc_ref[:, lo:hi] + jnp.dot(
                p.astype(v.dtype), v[:, lo:hi],
                preferred_element_type=jnp.float32)

    @pl.when(kt == pl.num_programs(2) - 1)
    def _finalize():
        # Per-head normalization (exact divide), then ONE full-depth K=C
        # projection matmul + bias over the concatenated context.
        for h in range(num_heads):
            lo = h * head_size
            hi = lo + head_size
            acc_ref[:, lo:hi] = acc_ref[:, lo:hi] / l_ref[:, h:h + 1]
        ctx = acc_ref[...].astype(wp_ref.dtype)                   # (blk, C) bf16
        out = jnp.dot(ctx, wp_ref[...],
                      preferred_element_type=jnp.float32) + b_ref[...]
        o_ref[0] = out.astype(o_ref.dtype)


# ----------------------------------------------------------------------------
# Parameter preparation (done ONCE, outside the per-call path)
# ----------------------------------------------------------------------------
def prepare_params(params):
    wq, wk, wv = params["wq"], params["wk"], params["wv"]         # (H, C, hs)
    num_heads, n_embd, head_size = wq.shape
    assert num_heads * head_size == n_embd

    def stack(w):  # (H, C, hs) -> (C, H*hs) so x @ W == concat_h(x @ W_h)
        return jnp.transpose(w, (1, 0, 2)).reshape(n_embd, num_heads * head_size)

    # NOTE: the PyTorch module scales scores by n_embd**-0.5 (NOT head_size);
    # reproduced exactly and folded into the Q weights here, once.
    scale = float(n_embd) ** (-0.5)
    w_qkv = jnp.concatenate([stack(wq) * scale, stack(wk), stack(wv)], axis=1)
    return {
        "w_qkv": w_qkv.astype(jnp.bfloat16),                      # (C, 3C)
        "w_proj": params["w_proj"].astype(jnp.bfloat16),          # (C, C)
        "b_proj": params["b_proj"].reshape(1, n_embd).astype(jnp.float32),
        "num_heads": int(num_heads),
        "head_size": int(head_size),
    }


# ----------------------------------------------------------------------------
# Wrapper
# ----------------------------------------------------------------------------
def multi_head_attention(x, prepared, *, block=None):
    """Equivalent of MutiHeadAttention.forward (eval mode). x: (B, T, C)."""
    B, T, C = x.shape
    num_heads = prepared["num_heads"]
    head_size = prepared["head_size"]
    assert num_heads * head_size == C

    if block is None:
        # 256 fits the v7x 64 MiB budget comfortably; v6e/v5e could use 512.
        block = min(T, 256)
    assert T % block == 0
    n_tiles = T // block

    w_qkv = prepared["w_qkv"]
    w_proj = prepared["w_proj"]
    b_proj = prepared["b_proj"]

    xb = x.astype(jnp.bfloat16)   # halve x DMA bytes; accumulation stays f32

    # ---- stage 1: QKV projection (each of q, k, v computed exactly once) ----
    q, k, v = pl.pallas_call(
        functools.partial(_qkv_kernel, n_embd=C),
        out_shape=tuple(jax.ShapeDtypeStruct((B, T, C), jnp.bfloat16)
                        for _ in range(3)),
        grid_spec=pltpu.PrefetchScalarGridSpec(
            num_scalar_prefetch=0,
            grid=(B, n_tiles),
            in_specs=[
                pl.BlockSpec((1, block, C), lambda b, i: (b, i, 0)),      # x
                pl.BlockSpec((C, 3 * C), lambda b, i: (0, 0)),            # W_qkv
            ],
            out_specs=[pl.BlockSpec((1, block, C), lambda b, i: (b, i, 0))] * 3,
        ),
        compiler_params=pltpu.CompilerParams(
            dimension_semantics=("parallel", "parallel"),
            vmem_limit_bytes=_VMEM_LIMIT_BYTES),
    )(xb, w_qkv)

    # ---- stage 2: flash attention + fused output projection ----
    kernel = functools.partial(_flash_mha_kernel, num_heads=num_heads,
                               head_size=head_size, block=block)
    return pl.pallas_call(
        kernel,
        out_shape=jax.ShapeDtypeStruct((B, T, C), x.dtype),
        grid_spec=pltpu.PrefetchScalarGridSpec(
            num_scalar_prefetch=0,
            grid=(B, n_tiles, n_tiles),
            in_specs=[
                pl.BlockSpec((1, block, C),
                             lambda b, qi, kt: (b, qi, 0)),               # q
                # clamp index for kt > qi -> skipped tiles are not re-DMA'd
                pl.BlockSpec((1, block, C),
                             lambda b, qi, kt: (b, jnp.minimum(kt, qi), 0)),  # k
                pl.BlockSpec((1, block, C),
                             lambda b, qi, kt: (b, jnp.minimum(kt, qi), 0)),  # v
                pl.BlockSpec((C, C), lambda b, qi, kt: (0, 0)),           # W_proj
                pl.BlockSpec((1, C), lambda b, qi, kt: (0, 0)),           # bias
            ],
            out_specs=pl.BlockSpec((1, block, C),
                                   lambda b, qi, kt: (b, qi, 0)),
            scratch_shapes=[
                pltpu.VMEM((block, num_heads), jnp.float32),   # running max / head
                pltpu.VMEM((block, num_heads), jnp.float32),   # running sum / head
                pltpu.VMEM((block, C), jnp.float32),           # context accumulator
            ],
        ),
        compiler_params=pltpu.CompilerParams(
            dimension_semantics=("parallel", "parallel", "arbitrary"),
            vmem_limit_bytes=_VMEM_LIMIT_BYTES),
    )(q, k, v, w_proj, b_proj)


def init_params(key, num_heads, head_size, n_embd):
    k1, k2, k3, k4, k5 = jax.random.split(key, 5)
    s = 0.02
    return {
        # per-head linear weights, stored as [in_features, out_features]
        "wq": s * jax.random.normal(k1, (num_heads, n_embd, head_size), jnp.float32),
        "wk": s * jax.random.normal(k2, (num_heads, n_embd, head_size), jnp.float32),
        "wv": s * jax.random.normal(k3, (num_heads, n_embd, head_size), jnp.float32),
        # projection: stored as [in, out] (transpose of PyTorch's [out, in])
        "w_proj": s * jax.random.normal(k4, (n_embd, n_embd), jnp.float32),
        "b_proj": s * jax.random.normal(k5, (n_embd,), jnp.float32),
    }


if __name__ == "__main__":
    # Small shapes consistent with the module: n_embd = num_heads * head_size.
    B, T = 2, 128
    num_heads, head_size = 4, 32
    n_embd = num_heads * head_size          # 128 (small stand-in for 384)

    key = jax.random.PRNGKey(0)
    kx, kp = jax.random.split(key)
    x = jax.random.normal(kx, (B, T, n_embd), jnp.float32)
    params = init_params(kp, num_heads, head_size, n_embd)
    prepared = prepare_params(params)       # stacked/bf16 weights, scale folded

    out = multi_head_attention(x, prepared)
    out = jax.block_until_ready(out)

    # Pure-JAX f32 reference (same math, eval-mode dropout).
    def ref(x, p):
        scale = n_embd ** (-0.5)
        mask = jnp.tril(jnp.ones((T, T), bool))
        outs = []
        for h in range(num_heads):
            q = x @ p["wq"][h]
            k = x @ p["wk"][h]
            v = x @ p["wv"][h]
            wei = (q @ jnp.swapaxes(k, -1, -2)) * scale
            wei = jnp.where(mask, wei, -jnp.inf)
            wei = jax.nn.softmax(wei, axis=-1)
            outs.append(wei @ v)
        cat = jnp.concatenate(outs, axis=-1)
        return cat @ p["w_proj"] + p["b_proj"]

    expected = ref(x, params)
    assert out.shape == (B, T, n_embd)
    # bf16 MXU operands (f32 accumulation + f32 softmax stats) => ~0.5% rel err
    # vs the pure-f32 reference; check both relative norm and elementwise.
    rel = jnp.linalg.norm(out - expected) / jnp.linalg.norm(expected)
    assert rel < 2e-2, float(rel)
    assert jnp.allclose(out, expected, atol=1e-2, rtol=5e-2), (
        float(jnp.max(jnp.abs(out - expected))))
    print("KERNEL_OK")
</pallas_src>

<mosaic_0001>
module attributes {stable_mosaic.version = 11 : i64} {
  func.func @_qkv_kernel(%arg0: i32, %arg1: i32, %arg2: memref<1x128x128xbf16, #tpu.memory_space<vmem>>, %arg3: memref<128x384xbf16, #tpu.memory_space<vmem>>, %arg4: memref<1x128x128xbf16, #tpu.memory_space<vmem>>, %arg5: memref<1x128x128xbf16, #tpu.memory_space<vmem>>, %arg6: memref<1x128x128xbf16, #tpu.memory_space<vmem>>) attributes {dimension_semantics = [#tpu.dimension_semantics<parallel>, #tpu.dimension_semantics<parallel>], iteration_bounds = array<i64: 2, 1>, scalar_prefetch = 0 : i64, scratch_operands = 0 : i64, tpu.core_type = #tpu.core_type<tc>, window_params = [{transform_indices = @transform_0, window_bounds = array<i64: 1, 128, 128>}, {pipeline_mode = #tpu.pipeline_mode<synchronous>, transform_indices = @transform_1, window_bounds = array<i64: 128, 384>}, {transform_indices = @transform_2, window_bounds = array<i64: 1, 128, 128>}, {transform_indices = @transform_3, window_bounds = array<i64: 1, 128, 128>}, {transform_indices = @transform_4, window_bounds = array<i64: 1, 128, 128>}]} {
    %c0 = arith.constant 0 : index
    %c0_0 = arith.constant 0 : index
    %c0_1 = arith.constant 0 : index
    %0 = vector.load %arg2[%c0, %c0_0, %c0_1] : memref<1x128x128xbf16, #tpu.memory_space<vmem>>, vector<1x128x128xbf16>
    %1 = vector.shape_cast %0 : vector<1x128x128xbf16> to vector<128x128xbf16>
    %c0_2 = arith.constant 0 : index
    %c0_3 = arith.constant 0 : index
    %2 = vector.load %arg3[%c0_2, %c0_3] : memref<128x384xbf16, #tpu.memory_space<vmem>>, vector<128x384xbf16>
    %cst = arith.constant dense<0.000000e+00> : vector<128x384xf32>
    %3 = tpu.matmul %1, %2, %cst {dimension_numbers = #tpu.dot_dimension_numbers<[1], [0], [0], [1], [0, 0, 1, 1], [], []>} : vector<128x128xbf16>, vector<128x384xbf16>, vector<128x384xf32> -> vector<128x384xf32>
    %4 = arith.truncf %3 : vector<128x384xf32> to vector<128x384xbf16>
    %5 = vector.extract_strided_slice %4 {offsets = [0, 0], sizes = [128, 128], strides = [1, 1]} : vector<128x384xbf16> to vector<128x128xbf16>
    %c0_4 = arith.constant 0 : index
    %c0_5 = arith.constant 0 : index
    %c0_6 = arith.constant 0 : index
    %6 = vector.load %arg4[%c0_4, %c0_5, %c0_6] : memref<1x128x128xbf16, #tpu.memory_space<vmem>>, vector<1x128x128xbf16>
    %7 = vector.shape_cast %6 : vector<1x128x128xbf16> to vector<128x128xbf16>
    %8 = vector.shape_cast %5 : vector<128x128xbf16> to vector<1x128x128xbf16>
    tpu.vector_store %arg4[%c0_4, %c0_5, %c0_6], %8 {strides = array<i32>} : memref<1x128x128xbf16, #tpu.memory_space<vmem>>, vector<1x128x128xbf16>,
    %9 = vector.extract_strided_slice %4 {offsets = [0, 128], sizes = [128, 128], strides = [1, 1]} : vector<128x384xbf16> to vector<128x128xbf16>
    %c0_7 = arith.constant 0 : index
    %c0_8 = arith.constant 0 : index
    %c0_9 = arith.constant 0 : index
    %10 = vector.load %arg5[%c0_7, %c0_8, %c0_9] : memref<1x128x128xbf16, #tpu.memory_space<vmem>>, vector<1x128x128xbf16>
    %11 = vector.shape_cast %10 : vector<1x128x128xbf16> to vector<128x128xbf16>
    %12 = vector.shape_cast %9 : vector<128x128xbf16> to vector<1x128x128xbf16>
    tpu.vector_store %arg5[%c0_7, %c0_8, %c0_9], %12 {strides = array<i32>} : memref<1x128x128xbf16, #tpu.memory_space<vmem>>, vector<1x128x128xbf16>,
    %13 = vector.extract_strided_slice %4 {offsets = [0, 256], sizes = [128, 128], strides = [1, 1]} : vector<128x384xbf16> to vector<128x128xbf16>
    %c0_10 = arith.constant 0 : index
    %c0_11 = arith.constant 0 : index
    %c0_12 = arith.constant 0 : index
    %14 = vector.load %arg6[%c0_10, %c0_11, %c0_12] : memref<1x128x128xbf16, #tpu.memory_space<vmem>>, vector<1x128x128xbf16>
    %15 = vector.shape_cast %14 : vector<1x128x128xbf16> to vector<128x128xbf16>
    %16 = vector.shape_cast %13 : vector<128x128xbf16> to vector<1x128x128xbf16>
    tpu.vector_store %arg6[%c0_10, %c0_11, %c0_12], %16 {strides = array<i32>} : memref<1x128x128xbf16, #tpu.memory_space<vmem>>, vector<1x128x128xbf16>,
    return
  }
  func.func @transform_0(%arg0: i32, %arg1: i32) -> (i32, i32, i32) {
    %c0_i32 = arith.constant 0 : i32
    %c0_i32_0 = arith.constant 0 : i32
    return %arg0, %arg1, %c0_i32 : i32, i32, i32
  }
  func.func @transform_1(%arg0: i32, %arg1: i32) -> (i32, i32) {
    %c0_i32 = arith.constant 0 : i32
    %c0_i32_0 = arith.constant 0 : i32
    %c0_i32_1 = arith.constant 0 : i32
    return %c0_i32, %c0_i32_0 : i32, i32
  }
  func.func @transform_2(%arg0: i32, %arg1: i32) -> (i32, i32, i32) {
    %c0_i32 = arith.constant 0 : i32
    %c0_i32_0 = arith.constant 0 : i32
    return %arg0, %arg1, %c0_i32 : i32, i32, i32
  }
  func.func @transform_3(%arg0: i32, %arg1: i32) -> (i32, i32, i32) {
    %c0_i32 = arith.constant 0 : i32
    %c0_i32_0 = arith.constant 0 : i32
    return %arg0, %arg1, %c0_i32 : i32, i32, i32
  }
  func.func @transform_4(%arg0: i32, %arg1: i32) -> (i32, i32, i32) {
    %c0_i32 = arith.constant 0 : i32
    %c0_i32_0 = arith.constant 0 : i32
    return %arg0, %arg1, %c0_i32 : i32, i32, i32
  }
}

</mosaic_0001>

<bundles_post_ra>
// kernel: tpu_custom_call.1
= control target key start
LH: loop header
LB: loop body
LE: loop exit
PB: predicated region body
PF: predicated region fallthrough
CT: control target
= control target key end

     0   :  { %s2243_s0 = inlined_call_operand.hbm [shape: bf16[2,128,128], index: 0, kind: input, shape index: {}]   ;;  %s2244_s1 = inlined_call_operand.hbm [shape: bf16[128,384], index: 1, kind: input, shape index: {}]   ;;  %s2245_s2 = inlined_call_operand.hbm [shape: bf16[2,128,128], index: 2, kind: output, shape index: {0}]   ;;  %s2246_s3 = inlined_call_operand.hbm [shape: bf16[2,128,128], index: 3, kind: output, shape index: {1}]   ;;  %s2247_s4 = inlined_call_operand.hbm [shape: bf16[2,128,128], index: 4, kind: output, shape index: {2}]  }
   0x1   :  { %2252 = sst [smem:[#allocation15_spill]] %s2243_s0 }
   0x2   :  { %2253 = sst [smem:[#allocation16_spill]] %s2244_s1 }
   0x3   :  { %10 = vsyncpa [#allocation3], 0 }
   0x4   :  { %12 = vsyncpa [#allocation3 + $0x1], 0 }
   0x5   :  { %13 = vsyncpa [#allocation6], 0 }
   0x6   :  { %14 = vsyncpa [#allocation4], 0 }
   0x7   :  { %16 = vsyncpa [#allocation4 + $0x1], 0 }
   0x8   :  { %17 = vsyncpa [#allocation9], 0 }
   0x9   :  { %19 = vsyncpa [#allocation9 + $0x1], 0  ;;  %s1895_s15 = smov 0   ;;  %s1897_s16 = smov 0  }
   0xa   :  { %s1899_s17 = smov 0   ;;  %s1901_s18 = smov 0  }
   0xb   :  { %s1903_s19 = smov 0   ;;  %s1905_s20 = smov 0  }
   0xc LB: > { %s1926_s21 = sadd.s32 4294967295, %s1856_s20   ;;  %s2251_s22 = sadd.s32 4294967294, %s1856_s20   ;;  %s1856_s20 = sphi %s1905_s20, %s25_s20   ;;  %s1852_s19 = sphi %s1903_s19, %s2276_s19   ;;  %s1848_s18 = sphi %s1901_s18, %s2275_s18   ;;  %s1844_s17 = sphi %s1899_s17, %s2274_s17   ;;  %s1840_s16 = sphi %s1897_s16, %s2273_s16   ;;  %s1836_s15 = sphi %s1895_s15, %s2272_s15  }
   0xd   : > { %p59_p0 = scmp.ne.s32.totalorder %s1840_s16, %s1836_s15  ;;  %p2248_p1 = scmp.eq.s32.totalorder %s1926_s21, 0 }
   0xe   : > { %p112_p3 = scmp.eq.s32.totalorder %s2251_s22, 1  ;;  %p1178_p5 = scmp.ge.s32.totalorder %s1856_s20, 1 }
   0xf   : > { %p1937_p4 = por %p2248_p1, %p59_p0  ;;  %p175_p7 = scmp.lt.s32.totalorder %s1856_s20, 3 }
  0x10   : > { %p1942_p6 = por %p112_p3, %p59_p0  ;;  %s1858_s26 = smov [#allocation5]  }
  0x11   : > { %s2254_s23 = scalar_select %p1937_p4, 1, 0 }
  0x12   : > { %s2255_s24 = scalar_select %p1942_p6, 1, 0 }
  0x13   : > { %p1947_p8 = pnand %p1178_p5, %p175_p7  ;;  %s187_s27 = sshll.u32 %s1858_s26, 4  ;;  %s188_s27 = int_to_ptr.vmem [resolvable:$true] %s187_s27 }
  0x14   : > { %s37_s29 = sadd.s32 1, %s1852_s19  ;;  %s2258_s1 = sld [smem:[#allocation16_spill]] }
  0x15   : > { %s2256_s25 = scalar_select %p1947_p8, 1, 0 }
  0x16   : > { %p1534_p9 = pneg %p1947_p8 }
  0x18   : > { %p1956_p11 = pnand %p1534_p9, %p2248_p1 }
  0x1a   : > { %s1652_s6 = scalar_lea.hbm %s2258_s1, 3072  ;;  %p1654_p13 = pneg %p1956_p11 }
  0x1b   : > { %p1653_p12 = scmp.ne.s32.totalorder %s2258_s1, %s1652_s6  ;;  %p1659_p5 = scmp.lt.u32.totalorder %s1652_s6, %s2258_s1 }
  0x1d   : > { %p1655_p0 = pnand %p1654_p13, %p1653_p12 }
  0x1f   : > { %p1656_p3 = pneg %p1655_p0 }
  0x21   : > { %p1661_p7 = pnand %p1659_p5, %p1656_p3 }
  0x23   : > { %1664 = shalt.err (!%p1661_p7)
}
  0x24   : > { %s1665_s11 = scalar_lea.vmem %s188_s27, 3072  ;;  %p1673_p2 = scmp.lt.s32.totalorder %s188_s27, %s188_s27 }
  0x25   : > { %p1666_p9 = scmp.ne.s32.totalorder %s188_s27, %s1665_s11  ;;  %p1674_p6 = scmp.lt.s32.totalorder %s1665_s11, %s1665_s11 }
  0x27   : > { %p1668_p10 = pnand %p1666_p9, %p1654_p13  ;;  %p1675_p4 = por %p1674_p6, %p1673_p2 }
  0x29   : > { %p1669_p1 = pneg %p1668_p10 }
  0x2b   : > { %p1676_p8 = pnand %p1675_p4, %p1669_p1 }
  0x2d   : > { %1679 = shalt.err (!%p1676_p8)
}
  0x2e   : > { %s1859_s12 = smov 192   ;;  %s1860_s13 = smov 12  }
  0x2f   : > { %1537 = dma.hbm_to_vmem [thread:$0]  (!%p1956_p11), %s2258_s1, 3072, %s188_s27, [#allocation6], %s1859_s12, %s1859_s12, %s1860_s13  }
  0x30   : > { %p39_p1 = scmp.ge.s32.totalorder %s37_s29, 2  ;;  %s46_s30 = sadd.s32 1, %s1844_s17 }
  0x31   : > { %p53_p2 = scmp.ne.s32.totalorder %s1844_s17, %s1840_s16  ;;  %p54_p4 = scmp.eq.s32.totalorder %s1856_s20, 0 }
  0x32   : > { %s2278_s29 = smov (%p39_p1, %s37_s29), 0  ;;  %p2260_p8 = scmp.eq.s32.totalorder %s1926_s21, 1 }
  0x33   : > { %p1983_p6 = por %p54_p4, %p53_p2  ;;  %s41_s28 = ssub.s32 %s1852_s19, %s2278_s29 }
  0x34   : > { %p1989_p10 = por %p2260_p8, %p53_p2  ;;  %p1553_p12 = scmp.lt.s32.totalorder %s1856_s20, 2 }
  0x35   : > { %p44_p11 = scmp.eq.s32.totalorder %s41_s28, 0  ;;  %s201_s27 = sand.u32 1, %s1844_s17  }
  0x36   : > { %s1181_s7 = sshll.u32 %s201_s27, 6  ;;  %s1281_s9 = sshll.u32 %s1852_s19, 10 }
  0x37   : > { %s1998_s8 = scalar_select %p44_p11, %s1844_s17, %s46_s30  }
  0x38   : > { %s2262_s0 = sld [smem:[#allocation15_spill]]  ;;  %s205_s13 = scalar_lea.vmem [#allocation2], %s1181_s7 }
  0x39   : > { %s214_s14 = sshll.u32 %s205_s13, 4  ;;  %p2010_p13 = pnand %p1553_p12, %p1983_p6  ;;  %s2006_s14 = int_to_ptr.vmem [resolvable:$true] %s214_s14 }
  0x3a   : > { %s2014_s30 = scalar_lea.sflag [#allocation3], %s201_s27 }
  0x3b   : > { %p1682_p3 = pneg %p2010_p13 }
  0x3e   : > { %s2004_s12 = scalar_lea.hbm %s2262_s0, %s1281_s9  ;;  %s1685_s5 = scalar_lea.hbm %s2262_s0, 2048 }
  0x3f   : > { %s1680_s28 = scalar_lea.hbm %s2004_s12, 1024  ;;  %p1686_p9 = scmp.lt.u32.totalorder %s2004_s12, %s2262_s0 }
  0x40   : > { %p1681_p0 = scmp.ne.s32.totalorder %s2004_s12, %s1680_s28  ;;  %p1687_p1 = scmp.lt.u32.totalorder %s1685_s5, %s1680_s28 }
  0x41   : > { %p1689_p4 = scmp.lt.u32.totalorder %s1680_s28, %s2004_s12 }
  0x42   : > { %p1683_p5 = pnand %p1682_p3, %p1681_p0  ;;  %p1688_p2 = por %p1687_p1, %p1686_p9 }
  0x44   : > { %p1684_p7 = pneg %p1683_p5  ;;  %p1690_p6 = por %p1689_p4, %p1688_p2 }
  0x46   : > { %p1691_p8 = pnand %p1690_p6, %p1684_p7 }
  0x48   : > { %1694 = shalt.err (!%p1691_p8)
}
  0x49   : > { %s1695_s27 = scalar_lea.vmem %s2006_s14, 1024  ;;  %s1861_s13 = smov [#allocation2]  }
  0x4a   : > { %p1696_p12 = scmp.ne.s32.totalorder %s2006_s14, %s1695_s27  ;;  %s1700_s7 = sshll.u32 %s1861_s13, 4  ;;  %s1701_s7 = int_to_ptr.vmem [resolvable:$false] %s1700_s7 }
  0x4b   : > { %s1702_s9 = scalar_lea.vmem %s1701_s7, 2048  ;;  %p1703_p5 = scmp.lt.s32.totalorder %s2006_s14, %s1701_s7 }
  0x4c   : > { %p1698_p11 = pnand %p1696_p12, %p1682_p3  ;;  %p1704_p9 = scmp.lt.s32.totalorder %s1702_s9, %s1695_s27 }
  0x4e   : > { %p1699_p0 = pneg %p1698_p11  ;;  %p1705_p1 = por %p1704_p9, %p1703_p5 }
  0x50   : > { %p1706_p2 = pnand %p1705_p1, %p1699_p0 }
  0x52   : > { %1709 = shalt.err (!%p1706_p2)
}
  0x53   : > { %s1862_s28 = smov 64   ;;  %s1863_s5 = smov 4  }
  0x54   : > { %1541 = dma.hbm_to_vmem [thread:$0]  (!%p2010_p13), %s2004_s12, 1024, %s2006_s14, %s2014_s30, %s1862_s28, %s1862_s28, %s1863_s5  }
  0x55   : > { %p2264_p3 = scmp.ne.s32.totalorder %s2256_s25, 0 }
  0x56   : > { %s2045_s10 = sand.u32 (!%p2264_p3), 1, %s1840_s16   ;;  %p2265_p7 = scmp.ne.s32.totalorder (!%p2264_p3), %s2254_s23, 0 }
  0x57   : > { %226 = sbr.rel (%p2264_p3) target bundleno = 465 (0x1d1), region = 28  ;;  %s2048_s11 = sshll.u32 (!%p2264_p3), %s2045_s10, 6 }
  0x58   : > { %s229_s27 = scalar_lea.sflag (!%p2264_p3), [#allocation3], %s2045_s10  ;;  %s2052_s13 = scalar_lea.vmem (!%p2264_p3), [#allocation2], %s2048_s11 }
  0x5e   : > { %1819 = dma.done.wait (%p2265_p7), %s229_s27, 1024  }
  0x5f   : > { %1821 = vsyncadd (%p2265_p7), %s229_s27, 4294966272  ;;  %p2266_p13 = scmp.eq.s32.totalorder %s1926_s21, 0 }
  0x61   : > { %1823 = dma.done.wait (%p2266_p13), [#allocation6], 3072   ;;  %p2267_p4 = pmov %p2266_p13 }
  0x62   : > { %v1864_v0 = vmov 0   ;;  %v1612_v1 = vld [vmem:[#allocation5 + $0x4] ss:$12 sps:$4 sm:$0xff]   ;;  %v1614_v2 = vld [vmem:[#allocation5] ss:$12 sps:$4 sm:$0xff]   ;;  %v1646_v28 = vld [vmem:[%s2052_s13 + $0x18] sm:$0xff]  }
  0x63   : > { %1825 = vsyncadd (%p2267_p4), [#allocation6], 4294964224  ;;  %532 = vmatprep.mubr.bf16.mxu0 %v1864_v0  ;;  %500 = vmatprep.subr.bf16.mxu0 %v1612_v1  ;;  %v1615_v3 = vld [vmem:[#allocation5 + $0x1c] ss:$12 sps:$4 sm:$0xff]   ;;  %v1617_v4 = vld [vmem:[#allocation5 + $0x18] ss:$12 sps:$4 sm:$0xff]  }
  0x64   : > { %501 = vmatpush1.bf16.msra.mxu0 %v1614_v2  ;;  %v1618_v5 = vld [vmem:[#allocation5 + $0x34] ss:$12 sps:$4 sm:$0xff]   ;;  %v1620_v6 = vld [vmem:[#allocation5 + $0x30] ss:$12 sps:$4 sm:$0xff]   ;;  %v1621_v7 = vld [vmem:[#allocation5 + $0x4c] ss:$12 sps:$4 sm:$0xff]  }
  0x65   : > { %502 = vmatprep.subr.bf16.mxu0 %v1615_v3  ;;  %v1623_v8 = vld [vmem:[#allocation5 + $0x48] ss:$12 sps:$4 sm:$0xff]   ;;  %v1624_v9 = vld [vmem:[#allocation5 + $0x64] ss:$12 sps:$4 sm:$0xff]   ;;  %v1638_v12 = vld [vmem:[#allocation5 + $0x20] ss:$12 sps:$4 sm:$0xff]  }
  0x66   : > { %v1636_v10 = vld [vmem:[#allocation5 + $0x8] ss:$12 sps:$4 sm:$0xff]   ;;  %v1637_v11 = vld [vmem:[%s2052_s13] sm:$0xff]   ;;  %v1641_v17 = vld [vmem:[#allocation5 + $0x50] ss:$12 sps:$4 sm:$0xff]   ;;  %s2079_s23 = scalar_lea.vmem [#allocation7], %s2048_s11 }
  0x67   : > { %1490 = vmatprep.subr.bf16.mxu1 %v1636_v10  ;;  %v1626_v13 = vld [vmem:[#allocation5 + $0x60] ss:$12 sps:$4 sm:$0xff]   ;;  %1506 = vmatprep.mubr.bf16.mxu1 %v1637_v11  ;;  %v1639_v14 = vld [vmem:[#allocation5 + $0x38] ss:$12 sps:$4 sm:$0xff]   ;;  %v1627_v15 = vld [vmem:[#allocation5 + $0x7c] ss:$12 sps:$4 sm:$0xff]  }
  0x68   : > { %503 = vmatpush1.bf16.msra.mxu0 %v1617_v4  ;;  %1491 = vmatpush3.bf16.msra.mxu1 %v1636_v10  ;;  %v1629_v16 = vld [vmem:[#allocation5 + $0x78] ss:$12 sps:$4 sm:$0xff]   ;;  %v1630_v18 = vld [vmem:[#allocation5 + $0x94] ss:$12 sps:$4 sm:$0xff]   ;;  %v1632_v19 = vld [vmem:[#allocation5 + $0x90] ss:$12 sps:$4 sm:$0xff]  }
  0x69   : > { %504 = vmatprep.subr.bf16.mxu0 %v1618_v5  ;;  %1492 = vmatprep.subr.bf16.mxu1 %v1638_v12  ;;  %v1642_v20 = vld [vmem:[#allocation5 + $0x68] ss:$12 sps:$4 sm:$0xff]   ;;  %v1633_v21 = vld [vmem:[#allocation5 + $0xac] ss:$12 sps:$4 sm:$0xff]   ;;  %v1647_v25 = vld [vmem:[#allocation5 + $0xb0] ss:$12 sps:$4 sm:$0xff]  }
  0x6a   : > { %v1635_v22 = vld [vmem:[#allocation5 + $0xa8] ss:$12 sps:$4 sm:$0xff]   ;;  %v1644_v23 = vld [vmem:[#allocation5 + $0x80] ss:$12 sps:$4 sm:$0xff]   ;;  %v1645_v24 = vld [vmem:[#allocation5 + $0x98] ss:$12 sps:$4 sm:$0xff]  }
  0x6b   : > { %v1640_v26 = vld [vmem:[%s2052_s13 + $0x8] sm:$0xff]   ;;  %v1643_v27 = vld [vmem:[%s2052_s13 + $0x10] sm:$0xff]   ;;  %v1648_v29 = vld [vmem:[%s2052_s13 + $0x20] sm:$0xff]   ;;  %s2083_s25 = scalar_lea.vmem [#allocation8], %s2048_s11  ;;  %s2089_s12 = scalar_lea.vmem [#allocation10], %s2048_s11 }
  0x6c   : > { %505 = vmatpush1.bf16.msra.mxu0 %v1620_v6  ;;  %1493 = vmatpush3.bf16.msra.mxu1 %v1638_v12  ;;  %v1649_v30 = vld [vmem:[%s2052_s13 + $0x28] sm:$0xff]   ;;  %v1650_v31 = vld [vmem:[%s2052_s13 + $0x30] sm:$0xff]   ;;  %v1651_v32 = vld [vmem:[%s2052_s13 + $0x38] sm:$0xff]   ;;  %s976_s14 = sshll.u32 %s2079_s23, 4  ;;  %s994_s26 = sshll.u32 %s2083_s25, 4  ;;  %s2111_s14 = int_to_ptr.vmem [resolvable:$true] %s976_s14  ;;  %s2113_s26 = int_to_ptr.vmem [resolvable:$true] %s994_s26 }
  0x6d   : > { %506 = vmatprep.subr.bf16.mxu0 %v1621_v7  ;;  %1494 = vmatprep.subr.bf16.mxu1 %v1639_v14  ;;  %s1330_s30 = sshll.u32 %s1848_s18, 10  ;;  %s1012_s7 = sshll.u32 %s2089_s12, 4  ;;  %s2128_s7 = int_to_ptr.vmem [resolvable:$true] %s1012_s7 }
  0x6e   : > { %s2121_s11 = scalar_lea.hbm %s2245_s2, %s1330_s30  ;;  %s2126_s22 = scalar_lea.hbm %s2246_s3, %s1330_s30 }
  0x6f   : > { %s2134_s9 = scalar_lea.hbm %s2247_s4, %s1330_s30  ;;  %s951_s0 = scalar_lea.sflag [#allocation4], %s2045_s10 }
  0x70   : > { %507 = vmatpush1.bf16.msra.mxu0 %v1623_v8  ;;  %1495 = vmatpush3.bf16.msra.mxu1 %v1639_v14  ;;  %s1710_s28 = scalar_lea.vmem %s2111_s14, 1024  ;;  %s1865_s5 = smov [#allocation7]  }
  0x71   : > { %508 = vmatprep.subr.bf16.mxu0 %v1624_v9  ;;  %1496 = vmatprep.subr.bf16.mxu1 %v1641_v17  ;;  %p1711_p6 = scmp.ne.s32.totalorder %s2111_s14, %s1710_s28  ;;  %s1714_s1 = sshll.u32 %s1865_s5, 4  ;;  %s1715_s1 = int_to_ptr.vmem [resolvable:$false] %s1714_s1 }
  0x72   : > { %s1716_s27 = scalar_lea.vmem %s1715_s1, 2048  ;;  %p1717_p11 = scmp.lt.s32.totalorder %s2111_s14, %s1715_s1 }
  0x73   : > { %p1712_p8 = pnand %p1711_p6, %p1989_p10  ;;  %p1718_p0 = scmp.lt.s32.totalorder %s1716_s27, %s1710_s28 }
  0x74   : > { %509 = vmatpush1.bf16.msra.mxu0 %v1626_v13  ;;  %1497 = vmatpush3.bf16.msra.mxu1 %v1641_v17 }
  0x75   : > { %510 = vmatprep.subr.bf16.mxu0 %v1627_v15  ;;  %1498 = vmatprep.subr.bf16.mxu1 %v1642_v20  ;;  %p1713_p12 = pneg %p1712_p8  ;;  %p1719_p5 = por %p1718_p0, %p1717_p11 }
  0x77   : > { %p1720_p9 = pnand %p1719_p5, %p1713_p12 }
  0x78   : > { %511 = vmatpush1.bf16.msra.mxu0 %v1629_v16  ;;  %1499 = vmatpush3.bf16.msra.mxu1 %v1642_v20 }
  0x79   : > { %512 = vmatprep.subr.bf16.mxu0 %v1630_v18  ;;  %1500 = vmatprep.subr.bf16.mxu1 %v1644_v23 }
  0x7c   : > { %513 = vmatpush1.bf16.msra.mxu0 %v1632_v19  ;;  %1501 = vmatpush3.bf16.msra.mxu1 %v1644_v23 }
  0x7d   : > { %514 = vmatprep.subr.bf16.mxu0 %v1633_v21  ;;  %1502 = vmatprep.subr.bf16.mxu1 %v1645_v24 }
  0x80   : > { %515 = vmatpush1.bf16.msra.mxu0 %v1635_v22  ;;  %1503 = vmatpush3.bf16.msra.mxu1 %v1645_v24 }
  0x81   : > { %1504 = vmatprep.subr.bf16.mxu1 %v1647_v25 }
  0x83   : > { %533 = vmatmul.mubr.bf16.vlgmr.msra.gmra.mrb[0].mxu0 %v1637_v11 }
  0x84   : > { %542 = vmatprep.mubr.bf16.mxu0 %v1864_v0  ;;  %1505 = vmatpush3.bf16.msra.mxu1 %v1647_v25 }
  0x87   : > { %1507 = vmatmul.mubr.bf16.vlgmr.msra.gmra.mrb[0].mxu1 %v1640_v26 }
  0x88   : > { %1510 = vmatprep.mubr.bf16.mxu1 %v1643_v27 }
  0x8b   : > { %543 = vmatmul.mubr.bf16.gmra.mrb[4].mxu0 %v1640_v26 }
  0x8c   : > { %552 = vmatprep.mubr.bf16.mxu0 %v1864_v0 }
  0x8f   : > { %1511 = vmatmul.mubr.bf16.gmra.mrb[4].mxu1 %v1646_v28 }
  0x90   : > { %1514 = vmatprep.mubr.bf16.mxu1 %v1648_v29 }
  0x93   : > { %553 = vmatmul.mubr.bf16.gmra.mrb[8].mxu0 %v1643_v27 }
  0x94   : > { %562 = vmatprep.mubr.bf16.mxu0 %v1864_v0 }
  0x97   : > { %1515 = vmatmul.mubr.bf16.gmra.mrb[8].mxu1 %v1649_v30 }
  0x98   : > { %1518 = vmatprep.mubr.bf16.mxu1 %v1650_v31 }
  0x9b   : > { %563 = vmatmul.mubr.bf16.gmra.mrb[12].mxu0 %v1646_v28 }
  0x9c   : > { %572 = vmatprep.mubr.bf16.mxu0 %v1864_v0 }
  0x9f   : > { %1519 = vmatmul.mubr.bf16.gmra.mrb[12].mxu1 %v1651_v32 }
  0xa3   : > { %573 = vmatmul.mubr.bf16.gmra.mrb[16].mxu0 %v1648_v29 }
  0xa4   : > { %582 = vmatprep.mubr.bf16.mxu0 %v1864_v0 }
  0xab   : > { %583 = vmatmul.mubr.bf16.gmra.mrb[20].mxu0 %v1649_v30 }
  0xac   : > { %592 = vmatprep.mubr.bf16.mxu0 %v1864_v0 }
  0xb3   : > { %593 = vmatmul.mubr.bf16.gmra.mrb[24].mxu0 %v1650_v31 }
  0xb4   : > { %602 = vmatprep.mubr.bf16.mxu0 %v1864_v0 }
  0xbb   : > { %603 = vmatmul.mubr.bf16.gmra.mrb[28].mxu0 %v1651_v32 }
 0x156   : > { %v534_v33 = vpop.f32.mrb[0].mxu0 }
 0x157   : > { %v536_v34 = vpop.f32.mrb[1].mxu0 }
 0x158   : > { %v538_v35 = vpop.f32.mrb[2].mxu0 }
 0x159   : > { %v1336_v36 = vpack.c.bf16 %v538_v35, %v534_v33  ;;  %v540_v37 = vpop.f32.mrb[3].mxu0 }
 0x15a   : > { %v1376_v38 = vpack.c.bf16 %v540_v37, %v536_v34  ;;  %v1508_v44 = vpop.f32.mrb[0].mxu1 }
 0x15b   : > { %1337 = vst [vmem:[%s2079_s23] sm:$0xff] %v1336_v36   ;;  %v647_v46 = vpop.f32.mrb[1].mxu1 }
 0x15c   : > { %1377 = vst [vmem:[%s2083_s25] sm:$0xff] %v1376_v38   ;;  %v1509_v47 = vpop.f32.mrb[2].mxu1 }
 0x15d   : > { %v1421_v48 = vpack.c.bf16 %v1509_v47, %v1508_v44  ;;  %v650_v49 = vpop.f32.mrb[3].mxu1 }
 0x15e   : > { %v544_v39 = vpop.f32.mrb[4].mxu0  ;;  %v1416_v50 = vpack.c.bf16 %v650_v49, %v647_v46 }
 0x15f   : > { %v546_v40 = vpop.f32.mrb[5].mxu0  ;;  %1467 = vst [vmem:[%s2089_s12 + $0x8] sm:$0xff] %v1421_v48  }
 0x160   : > { %v548_v41 = vpop.f32.mrb[6].mxu0  ;;  %1417 = vst [vmem:[%s2089_s12] sm:$0xff] %v1416_v50  }
 0x161   : > { %v1341_v42 = vpack.c.bf16 %v548_v41, %v544_v39  ;;  %v550_v43 = vpop.f32.mrb[7].mxu0 }
 0x162   : > { %v1381_v45 = vpack.c.bf16 %v550_v43, %v546_v40  ;;  %v1512_v56 = vpop.f32.mrb[4].mxu1 }
 0x163   : > { %1453 = vst [vmem:[%s2079_s23 + $0x8] sm:$0xff] %v1341_v42   ;;  %v663_v58 = vpop.f32.mrb[5].mxu1 }
 0x164   : > { %1460 = vst [vmem:[%s2083_s25 + $0x8] sm:$0xff] %v1381_v45   ;;  %v1513_v59 = vpop.f32.mrb[6].mxu1 }
 0x165   : > { %v1431_v60 = vpack.c.bf16 %v1513_v59, %v1512_v56  ;;  %v666_v61 = vpop.f32.mrb[7].mxu1 }
 0x166   : > { %v554_v51 = vpop.f32.mrb[8].mxu0  ;;  %v1426_v62 = vpack.c.bf16 %v666_v61, %v663_v58 }
 0x167   : > { %v556_v52 = vpop.f32.mrb[9].mxu0  ;;  %1469 = vst [vmem:[%s2089_s12 + $0x18] sm:$0xff] %v1431_v60  }
 0x168   : > { %v558_v53 = vpop.f32.mrb[10].mxu0  ;;  %1468 = vst [vmem:[%s2089_s12 + $0x10] sm:$0xff] %v1426_v62  }
 0x169   : > { %v1346_v54 = vpack.c.bf16 %v558_v53, %v554_v51  ;;  %v560_v55 = vpop.f32.mrb[11].mxu0 }
 0x16a   : > { %v1386_v57 = vpack.c.bf16 %v560_v55, %v556_v52  ;;  %v1516_v4 = vpop.f32.mrb[8].mxu1 }
 0x16b   : > { %1454 = vst [vmem:[%s2079_s23 + $0x10] sm:$0xff] %v1346_v54   ;;  %v679_v6 = vpop.f32.mrb[9].mxu1 }
 0x16c   : > { %1461 = vst [vmem:[%s2083_s25 + $0x10] sm:$0xff] %v1386_v57   ;;  %v1517_v7 = vpop.f32.mrb[10].mxu1 }
 0x16d   : > { %v1441_v8 = vpack.c.bf16 %v1517_v7, %v1516_v4  ;;  %v682_v9 = vpop.f32.mrb[11].mxu1 }
 0x16e   : > { %v564_v63 = vpop.f32.mrb[12].mxu0  ;;  %v1436_v10 = vpack.c.bf16 %v682_v9, %v679_v6 }
 0x16f   : > { %v566_v0 = vpop.f32.mrb[13].mxu0  ;;  %1471 = vst [vmem:[%s2089_s12 + $0x28] sm:$0xff] %v1441_v8  }
 0x170   : > { %v568_v1 = vpop.f32.mrb[14].mxu0  ;;  %1470 = vst [vmem:[%s2089_s12 + $0x20] sm:$0xff] %v1436_v10  }
 0x171   : > { %v1351_v2 = vpack.c.bf16 %v568_v1, %v564_v63  ;;  %v570_v3 = vpop.f32.mrb[15].mxu0 }
 0x172   : > { %v1391_v5 = vpack.c.bf16 %v570_v3, %v566_v0  ;;  %v1520_v16 = vpop.f32.mrb[12].mxu1 }
 0x173   : > { %1455 = vst [vmem:[%s2079_s23 + $0x18] sm:$0xff] %v1351_v2   ;;  %v695_v18 = vpop.f32.mrb[13].mxu1 }
 0x174   : > { %1462 = vst [vmem:[%s2083_s25 + $0x18] sm:$0xff] %v1391_v5   ;;  %v1521_v19 = vpop.f32.mrb[14].mxu1 }
 0x175   : > { %v1451_v20 = vpack.c.bf16 %v1521_v19, %v1520_v16  ;;  %v698_v21 = vpop.f32.mrb[15].mxu1 }
 0x176   : > { %v574_v11 = vpop.f32.mrb[16].mxu0  ;;  %v1446_v22 = vpack.c.bf16 %v698_v21, %v695_v18 }
 0x177   : > { %v576_v12 = vpop.f32.mrb[17].mxu0  ;;  %1473 = vst [vmem:[%s2089_s12 + $0x38] sm:$0xff] %v1451_v20  }
 0x178   : > { %v578_v13 = vpop.f32.mrb[18].mxu0  ;;  %1472 = vst [vmem:[%s2089_s12 + $0x30] sm:$0xff] %v1446_v22  }
 0x179   : > { %v1356_v14 = vpack.c.bf16 %v578_v13, %v574_v11  ;;  %v580_v15 = vpop.f32.mrb[19].mxu0 }
 0x17a   : > { %v1396_v17 = vpack.c.bf16 %v580_v15, %v576_v12 }
 0x17b   : > { %1456 = vst [vmem:[%s2079_s23 + $0x20] sm:$0xff] %v1356_v14  }
 0x17c   : > { %1463 = vst [vmem:[%s2083_s25 + $0x20] sm:$0xff] %v1396_v17  }
 0x17e   : > { %v584_v23 = vpop.f32.mrb[20].mxu0 }
 0x17f   : > { %v586_v24 = vpop.f32.mrb[21].mxu0 }
 0x180   : > { %v588_v25 = vpop.f32.mrb[22].mxu0 }
 0x181   : > { %v1361_v26 = vpack.c.bf16 %v588_v25, %v584_v23  ;;  %v590_v27 = vpop.f32.mrb[23].mxu0 }
 0x182   : > { %v1401_v28 = vpack.c.bf16 %v590_v27, %v586_v24 }
 0x183   : > { %1457 = vst [vmem:[%s2079_s23 + $0x28] sm:$0xff] %v1361_v26  }
 0x184   : > { %1464 = vst [vmem:[%s2083_s25 + $0x28] sm:$0xff] %v1401_v28  }
 0x186   : > { %v594_v29 = vpop.f32.mrb[24].mxu0 }
 0x187   : > { %v596_v30 = vpop.f32.mrb[25].mxu0 }
 0x188   : > { %v598_v31 = vpop.f32.mrb[26].mxu0 }
 0x189   : > { %v1366_v32 = vpack.c.bf16 %v598_v31, %v594_v29  ;;  %v600_v33 = vpop.f32.mrb[27].mxu0 }
 0x18a   : > { %v1406_v34 = vpack.c.bf16 %v600_v33, %v596_v30 }
 0x18b   : > { %1458 = vst [vmem:[%s2079_s23 + $0x30] sm:$0xff] %v1366_v32  }
 0x18c   : > { %1465 = vst [vmem:[%s2083_s25 + $0x30] sm:$0xff] %v1406_v34  }
 0x18e   : > { %v604_v35 = vpop.f32.mrb[28].mxu0 }
 0x18f   : > { %v606_v36 = vpop.f32.mrb[29].mxu0 }
 0x190   : > { %v608_v37 = vpop.f32.mrb[30].mxu0 }
 0x191   : > { %v1371_v38 = vpack.c.bf16 %v608_v37, %v604_v35  ;;  %v610_v39 = vpop.f32.mrb[31].mxu0 }
 0x192   : > { %v1411_v40 = vpack.c.bf16 %v610_v39, %v606_v36 }
 0x193   : > { %1459 = vst [vmem:[%s2079_s23 + $0x38] sm:$0xff] %v1371_v38  }
 0x194   : > { %1466 = vst [vmem:[%s2083_s25 + $0x38] sm:$0xff] %v1411_v40  }
 0x195   : > { %1723 = shalt.err (!%p1720_p9)
}
 0x196   : > { %s1724_s23 = scalar_lea.hbm %s2121_s11, 1024  ;;  %s1728_s13 = scalar_lea.hbm %s2245_s2, 2048 }
 0x197   : > { %p1725_p1 = scmp.ne.s32.totalorder %s2121_s11, %s1724_s23  ;;  %p1729_p7 = scmp.lt.u32.totalorder %s2121_s11, %s2245_s2 }
 0x198   : > { %p1730_p13 = scmp.lt.u32.totalorder %s1728_s13, %s1724_s23  ;;  %p1732_p6 = scmp.lt.u32.totalorder %s1724_s23, %s2121_s11 }
 0x199   : > { %p1726_p2 = pnand %p1725_p1, %p1989_p10 }
 0x19a   : > { %p1731_p4 = por %p1730_p13, %p1729_p7 }
 0x19b   : > { %p1727_p3 = pneg %p1726_p2 }
 0x19c   : > { %p1733_p8 = por %p1732_p6, %p1731_p4 }
 0x19e   : > { %p1734_p12 = pnand %p1733_p8, %p1727_p3 }
 0x1a0   : > { %1737 = shalt.err (!%p1734_p12)
}
 0x1a1   : > { %s1866_s12 = smov 64   ;;  %s1867_s28 = smov 4  }
 0x1a2   : > { %1528 = dma.vmem_to_hbm [thread:$0]  (%p1989_p10), %s2111_s14, 1024, %s2121_s11, %s951_s0, %s1866_s12, %s1866_s12, %s1867_s28  }
 0x1a3   : > { %s2268_s5 = sand.u32 1, %s1926_s21   ;;  %s1738_s23 = scalar_lea.vmem %s2113_s26, 1024 }
 0x1a4   : > { %s2166_s27 = scalar_lea.sflag [#allocation9], %s2268_s5  ;;  %p1739_p11 = scmp.ne.s32.totalorder %s2113_s26, %s1738_s23 }
 0x1a5   : > { %s1868_s25 = smov [#allocation8]  }
 0x1a6   : > { %p1740_p0 = pnand %p1739_p11, %p1989_p10  ;;  %s1742_s30 = sshll.u32 %s1868_s25, 4  ;;  %s1743_s30 = int_to_ptr.vmem [resolvable:$false] %s1742_s30 }
 0x1a7   : > { %s1744_s13 = scalar_lea.vmem %s1743_s30, 2048  ;;  %p1745_p9 = scmp.lt.s32.totalorder %s2113_s26, %s1743_s30 }
 0x1a8   : > { %p1741_p5 = pneg %p1740_p0  ;;  %p1746_p1 = scmp.lt.s32.totalorder %s1744_s13, %s1738_s23 }
 0x1aa   : > { %p1747_p2 = por %p1746_p1, %p1745_p9 }
 0x1ac   : > { %p1748_p3 = pnand %p1747_p2, %p1741_p5 }
 0x1ae   : > { %1751 = shalt.err (!%p1748_p3)
}
 0x1af   : > { %s1752_s0 = scalar_lea.hbm %s2126_s22, 1024  ;;  %s1756_s14 = scalar_lea.hbm %s2246_s3, 2048 }
 0x1b0   : > { %p1753_p7 = scmp.ne.s32.totalorder %s2126_s22, %s1752_s0  ;;  %p1757_p6 = scmp.lt.u32.totalorder %s2126_s22, %s2246_s3 }
 0x1b1   : > { %p1758_p8 = scmp.lt.u32.totalorder %s1756_s14, %s1752_s0  ;;  %p1760_p11 = scmp.lt.u32.totalorder %s1752_s0, %s2126_s22 }
 0x1b2   : > { %p1754_p13 = pnand %p1753_p7, %p1989_p10 }
 0x1b3   : > { %p1759_p12 = por %p1758_p8, %p1757_p6 }
 0x1b4   : > { %p1755_p4 = pneg %p1754_p13 }
 0x1b5   : > { %p1761_p0 = por %p1760_p11, %p1759_p12 }
 0x1b7   : > { %p1762_p5 = pnand %p1761_p0, %p1755_p4 }
 0x1b9   : > { %1765 = shalt.err (!%p1762_p5)
}
 0x1ba   : > { %1529 = dma.vmem_to_hbm [thread:$0]  (%p1989_p10), %s2113_s26, 1024, %s2126_s22, %s2166_s27, %s1866_s12, %s1866_s12, %s1867_s28  }
 0x1bb   : > { %s1766_s1 = scalar_lea.vmem %s2128_s7, 1024  ;;  %s1869_s5 = smov [#allocation10]  }
 0x1bc   : > { %p1767_p9 = scmp.ne.s32.totalorder %s2128_s7, %s1766_s1  ;;  %s1770_s23 = sshll.u32 %s1869_s5, 4  ;;  %s1771_s23 = int_to_ptr.vmem [resolvable:$false] %s1770_s23 }
 0x1bd   : > { %s1772_s25 = scalar_lea.vmem %s1771_s23, 2048  ;;  %p1773_p3 = scmp.lt.s32.totalorder %s2128_s7, %s1771_s23 }
 0x1be   : > { %p1768_p1 = pnand %p1767_p9, %p1989_p10  ;;  %p1774_p7 = scmp.lt.s32.totalorder %s1772_s25, %s1766_s1 }
 0x1c0   : > { %p1769_p2 = pneg %p1768_p1  ;;  %p1775_p13 = por %p1774_p7, %p1773_p3 }
 0x1c2   : > { %p1776_p4 = pnand %p1775_p13, %p1769_p2 }
 0x1c4   : > { %1779 = shalt.err (!%p1776_p4)
}
 0x1c5   : > { %s1780_s22 = scalar_lea.hbm %s2134_s9, 1024  ;;  %s1784_s13 = scalar_lea.hbm %s2247_s4, 2048 }
 0x1c6   : > { %p1781_p6 = scmp.ne.s32.totalorder %s2134_s9, %s1780_s22  ;;  %p1785_p11 = scmp.lt.u32.totalorder %s2134_s9, %s2247_s4 }
 0x1c7   : > { %p1786_p0 = scmp.lt.u32.totalorder %s1784_s13, %s1780_s22  ;;  %p1788_p9 = scmp.lt.u32.totalorder %s1780_s22, %s2134_s9 }
 0x1c8   : > { %p1782_p8 = pnand %p1781_p6, %p1989_p10 }
 0x1c9   : > { %p1787_p5 = por %p1786_p0, %p1785_p11 }
 0x1ca   : > { %p1783_p12 = pneg %p1782_p8 }
 0x1cb   : > { %p1789_p1 = por %p1788_p9, %p1787_p5 }
 0x1cd   : > { %p1790_p2 = pnand %p1789_p1, %p1783_p12 }
 0x1cf   : > { %1793 = shalt.err (!%p1790_p2)
}
 0x1d0   : > { %1530 = dma.vmem_to_hbm [thread:$0]  (%p1989_p10), %s2128_s7, 1024, %s2134_s9, %s2166_s27, %s1866_s12, %s1866_s12, %s1867_s28  }
 0x1d1 PF: > { %s1027_s10 = sand.u32 1, %s1836_s15   ;;  %p2269_p3 = scmp.ne.s32.totalorder %s2255_s24, 0 }
 0x1d2   : > { %p2270_p7 = scmp.ge.s32.totalorder %s1856_s20, 2  ;;  %s1028_s14 = scalar_lea.sflag [#allocation4], %s1027_s10 }
 0x1d4   : > { %p1543_p13 = pnand %p2270_p7, %p2269_p3 }
 0x1d6   : > { %1827 = dma.done.wait (!%p1543_p13), %s1028_s14, 1024  }
 0x1d7   : > { %1829 = vsyncadd (!%p1543_p13), %s1028_s14, 4294966272  ;;  %s2271_s6 = sadd.s32 4294967294, %s1856_s20  }
 0x1d8   : > { %s1036_s11 = sand.u32 1, %s2271_s6  }
 0x1d9   : > { %s1037_s18 = scalar_lea.sflag [#allocation9], %s1036_s11 }
 0x1da   : > { %1831 = dma.done.wait (!%p1543_p13), %s1037_s18, 2048  }
 0x1db   : > { %1833 = vsyncadd (!%p1543_p13), %s1037_s18, 4294965248  ;;  %s25_s20 = sadd.s32 1, %s1856_s20   ;;  %s2272_s15 = smov %s1840_s16 }
 0x1dc   : > { %p22_p10 = scmp.ge.s32.totalorder %s25_s20, 4   ;;  %s2273_s16 = smov %s1844_s17 }
 0x1dd   : > { %s2274_s17 = smov %s1998_s8  ;;  %s2275_s18 = smov %s1852_s19 }
 0x1de   : > { %s2276_s19 = smov %s2278_s29  ;;  %24 = sbr.rel (!%p22_p10) target bundleno = 12 (0xc), region = 109 }
 0x1e5   :  { %1051 = vsyncpa [#allocation3], 1 }
 0x1e6   :  { %1053 = vsyncpa [#allocation3 + $0x1], 1 }
 0x1e7   :  { %1054 = vsyncpa [#allocation6], 1 }
 0x1e8   :  { %1055 = vsyncpa [#allocation4], 1 }
 0x1e9   :  { %1057 = vsyncpa [#allocation4 + $0x1], 1 }
 0x1ea   :  { %1058 = vsyncpa [#allocation9], 1 }
 0x1eb   :  { %1060 = vsyncpa [#allocation9 + $0x1], 1 }

</bundles_post_ra>
